<compile_context>
chip_gen: v6e
topology: v6e:2x2x1
jax: 0.10.0
libtpu: 0.0.40
codegen_flags: <defaults>
</compile_context>

<pallas_src>
import math

import jax
import jax.numpy as jnp
from jax.experimental import pallas as pl
from jax.experimental.pallas import tpu as pltpu

OUTPUT_DIM = 32  # args.encoder.output_dim


# ---------------- Pallas kernel (entire forward, fused) ----------------
def _mlp_kernel(x_ref, w1_ref, b1_ref, w2_ref, b2_ref, o_ref):
    # linear1 + bias + ReLU + linear2 + bias, all in VMEM.
    h = jnp.dot(x_ref[...], w1_ref[...], preferred_element_type=jnp.float32)
    h = jnp.maximum(h + b1_ref[...], 0.0)
    y = jnp.dot(h, w2_ref[...], preferred_element_type=jnp.float32)
    o_ref[...] = (y + b2_ref[...]).astype(o_ref.dtype)


def _round_up(x, m):
    return ((x + m - 1) // m) * m


def position_encoder_forward(params, x, *, row_tile=256):
    """x: (..., 2) float -> (..., OUTPUT_DIM) float32."""
    w1, b1, w2, b2 = params["w1"], params["b1"], params["w2"], params["b2"]
    d_in = w1.shape[0]
    d_out = w2.shape[1]

    lead_shape = x.shape[:-1]
    m = math.prod(lead_shape) if lead_shape else 1
    x2 = x.reshape(m, d_in).astype(jnp.float32)

    # Row tile: multiple of 8 sublanes; cap it so the per-step footprint stays
    # tiny on every generation (incl. v7x's 64 MiB VMEM).  Pad rows so the
    # grid divides evenly; padded rows are zeros and sliced off afterwards.
    tm = min(row_tile, _round_up(m, 8))
    mp = _round_up(m, tm)
    if mp != m:
        x2 = jnp.pad(x2, ((0, mp - m), (0, 0)))

    out = pl.pallas_call(
        _mlp_kernel,
        out_shape=jax.ShapeDtypeStruct((mp, d_out), jnp.float32),
        grid=(mp // tm,),
        in_specs=[
            pl.BlockSpec((tm, d_in), lambda i: (i, 0)),        # x rows (tiled)
            pl.BlockSpec((d_in, d_out), lambda i: (0, 0)),     # W1 (resident)
            pl.BlockSpec((1, d_out), lambda i: (0, 0)),        # b1 (resident)
            pl.BlockSpec((d_out, d_out), lambda i: (0, 0)),    # W2 (resident)
            pl.BlockSpec((1, d_out), lambda i: (0, 0)),        # b2 (resident)
        ],
        out_specs=pl.BlockSpec((tm, d_out), lambda i: (i, 0)),
        compiler_params=pltpu.CompilerParams(
            dimension_semantics=("parallel",)),
    )(x2, w1, b1, w2, b2)

    return out[:m].reshape(*lead_shape, d_out)


# ---------------- deterministic parameter init ----------------
def init_params(key, d_out=OUTPUT_DIM):
    k1, k2, k3, k4 = jax.random.split(key, 4)
    w1 = jax.random.normal(k1, (2, d_out), jnp.float32) / jnp.sqrt(2.0)
    b1 = jax.random.normal(k2, (1, d_out), jnp.float32) * 0.01
    w2 = jax.random.normal(k3, (d_out, d_out), jnp.float32) / jnp.sqrt(float(d_out))
    b2 = jax.random.normal(k4, (1, d_out), jnp.float32) * 0.01
    return {"w1": w1, "b1": b1, "w2": w2, "b2": b2}


# ---------------- pure-JAX reference (semantics check) ----------------
def reference_forward(params, x):
    x = x.astype(jnp.float32)
    h = jnp.maximum(x @ params["w1"] + params["b1"], 0.0)
    return h @ params["w2"] + params["b2"]


if __name__ == "__main__":
    key = jax.random.PRNGKey(0)
    pkey, xkey = jax.random.split(key)
    params = init_params(pkey)

    # Positions: batch of 2, 8 (x, y) coordinates each -> last dim 2 as the
    # module's Linear(2, output_dim) requires.
    B, N = 2, 8
    x = jax.random.normal(xkey, (B, N, 2), jnp.float32)

    out = jax.jit(position_encoder_forward)(params, x)
    out = jax.block_until_ready(out)
    assert out.shape == (B, N, OUTPUT_DIM), out.shape

    ref = jax.block_until_ready(jax.jit(reference_forward)(params, x))
    max_err = float(jnp.max(jnp.abs(out - ref)))
    assert jnp.allclose(out, ref, rtol=1e-5, atol=1e-5), max_err

    print("KERNEL_OK")
</pallas_src>

<mosaic_0001>
module attributes {stable_mosaic.version = 11 : i64} {
  func.func @_mlp_kernel(%arg0: i32, %arg1: memref<16x2xf32, #tpu.memory_space<vmem>>, %arg2: memref<2x32xf32, #tpu.memory_space<vmem>>, %arg3: memref<1x32xf32, #tpu.memory_space<vmem>>, %arg4: memref<32x32xf32, #tpu.memory_space<vmem>>, %arg5: memref<1x32xf32, #tpu.memory_space<vmem>>, %arg6: memref<16x32xf32, #tpu.memory_space<vmem>>) attributes {dimension_semantics = [#tpu.dimension_semantics<parallel>], iteration_bounds = array<i64: 1>, scalar_prefetch = 0 : i64, scratch_operands = 0 : i64, tpu.core_type = #tpu.core_type<tc>, window_params = [{transform_indices = @transform_0, window_bounds = array<i64: 16, 2>}, {pipeline_mode = #tpu.pipeline_mode<synchronous>, transform_indices = @transform_1, window_bounds = array<i64: 2, 32>}, {pipeline_mode = #tpu.pipeline_mode<synchronous>, transform_indices = @transform_2, window_bounds = array<i64: 1, 32>}, {pipeline_mode = #tpu.pipeline_mode<synchronous>, transform_indices = @transform_3, window_bounds = array<i64: 32, 32>}, {pipeline_mode = #tpu.pipeline_mode<synchronous>, transform_indices = @transform_4, window_bounds = array<i64: 1, 32>}, {transform_indices = @transform_5, window_bounds = array<i64: 16, 32>}]} {
    %c0 = arith.constant 0 : index
    %c0_0 = arith.constant 0 : index
    %0 = vector.load %arg1[%c0, %c0_0] : memref<16x2xf32, #tpu.memory_space<vmem>>, vector<16x2xf32>
    %c0_1 = arith.constant 0 : index
    %c0_2 = arith.constant 0 : index
    %1 = vector.load %arg2[%c0_1, %c0_2] : memref<2x32xf32, #tpu.memory_space<vmem>>, vector<2x32xf32>
    %cst = arith.constant dense<0.000000e+00> : vector<16x32xf32>
    %2 = tpu.matmul %0, %1, %cst {dimension_numbers = #tpu.dot_dimension_numbers<[1], [0], [0], [1], [0, 0, 1, 1], [], []>} : vector<16x2xf32>, vector<2x32xf32>, vector<16x32xf32> -> vector<16x32xf32>
    %c0_3 = arith.constant 0 : index
    %c0_4 = arith.constant 0 : index
    %3 = vector.load %arg3[%c0_3, %c0_4] : memref<1x32xf32, #tpu.memory_space<vmem>>, vector<1x32xf32>
    %4 = vector.broadcast %3 : vector<1x32xf32> to vector<16x32xf32>
    %5 = arith.addf %2, %4 : vector<16x32xf32>
    %cst_5 = arith.constant 0.000000e+00 : f32
    %6 = vector.broadcast %cst_5 : f32 to vector<16x32xf32>
    %7 = arith.maximumf %5, %6 : vector<16x32xf32>
    %c0_6 = arith.constant 0 : index
    %c0_7 = arith.constant 0 : index
    %8 = vector.load %arg4[%c0_6, %c0_7] : memref<32x32xf32, #tpu.memory_space<vmem>>, vector<32x32xf32>
    %cst_8 = arith.constant dense<0.000000e+00> : vector<16x32xf32>
    %9 = tpu.matmul %7, %8, %cst_8 {dimension_numbers = #tpu.dot_dimension_numbers<[1], [0], [0], [1], [0, 0, 1, 1], [], []>} : vector<16x32xf32>, vector<32x32xf32>, vector<16x32xf32> -> vector<16x32xf32>
    %c0_9 = arith.constant 0 : index
    %c0_10 = arith.constant 0 : index
    %10 = vector.load %arg5[%c0_9, %c0_10] : memref<1x32xf32, #tpu.memory_space<vmem>>, vector<1x32xf32>
    %11 = vector.broadcast %10 : vector<1x32xf32> to vector<16x32xf32>
    %12 = arith.addf %9, %11 : vector<16x32xf32>
    %c0_11 = arith.constant 0 : index
    %c0_12 = arith.constant 0 : index
    %13 = vector.load %arg6[%c0_11, %c0_12] : memref<16x32xf32, #tpu.memory_space<vmem>>, vector<16x32xf32>
    tpu.vector_store %arg6[%c0_11, %c0_12], %12 {strides = array<i32>} : memref<16x32xf32, #tpu.memory_space<vmem>>, vector<16x32xf32>,
    return
  }
  func.func @transform_0(%arg0: i32) -> (i32, i32) {
    %c0_i32 = arith.constant 0 : i32
    %c0_i32_0 = arith.constant 0 : i32
    return %arg0, %c0_i32 : i32, i32
  }
  func.func @transform_1(%arg0: i32) -> (i32, i32) {
    %c0_i32 = arith.constant 0 : i32
    %c0_i32_0 = arith.constant 0 : i32
    %c0_i32_1 = arith.constant 0 : i32
    return %c0_i32, %c0_i32_0 : i32, i32
  }
  func.func @transform_2(%arg0: i32) -> (i32, i32) {
    %c0_i32 = arith.constant 0 : i32
    %c0_i32_0 = arith.constant 0 : i32
    %c0_i32_1 = arith.constant 0 : i32
    return %c0_i32, %c0_i32_0 : i32, i32
  }
  func.func @transform_3(%arg0: i32) -> (i32, i32) {
    %c0_i32 = arith.constant 0 : i32
    %c0_i32_0 = arith.constant 0 : i32
    %c0_i32_1 = arith.constant 0 : i32
    return %c0_i32, %c0_i32_0 : i32, i32
  }
  func.func @transform_4(%arg0: i32) -> (i32, i32) {
    %c0_i32 = arith.constant 0 : i32
    %c0_i32_0 = arith.constant 0 : i32
    %c0_i32_1 = arith.constant 0 : i32
    return %c0_i32, %c0_i32_0 : i32, i32
  }
  func.func @transform_5(%arg0: i32) -> (i32, i32) {
    %c0_i32 = arith.constant 0 : i32
    %c0_i32_0 = arith.constant 0 : i32
    return %arg0, %c0_i32 : i32, i32
  }
}

</mosaic_0001>

<bundles_post_ra>
// kernel: position_encoder_forward.1
= control target key start
LH: loop header
LB: loop body
LE: loop exit
PB: predicated region body
PF: predicated region fallthrough
CT: control target
= control target key end

     0   :  { %10 = vsyncpa [#allocation3], 0  ;;  %s386_s0 = inlined_call_operand.vmem [shape: f32[16,2], index: 0, kind: input, shape index: {}]   ;;  %s387_s1 = inlined_call_operand.vmem [shape: f32[2,32], index: 1, kind: input, shape index: {}]   ;;  %s388_s2 = inlined_call_operand.vmem [shape: f32[1,32], index: 2, kind: input, shape index: {}]   ;;  %s389_s3 = inlined_call_operand.hbm [shape: f32[32,32], index: 3, kind: input, shape index: {}]   ;;  %s390_s4 = inlined_call_operand.vmem [shape: f32[1,32], index: 4, kind: input, shape index: {}]   ;;  %s391_s5 = inlined_call_operand.hbm [shape: f32[16,32], index: 5, kind: output, shape index: {}]  }
   0x1   :  { %11 = vsyncpa [#allocation4], 0  ;;  %s325_s18 = smov [#allocation2]  }
   0x2   :  { %s23_s19 = sshll.u32 %s325_s18, 4  ;;  %s24_s19 = int_to_ptr.vmem [resolvable:$true] %s23_s19 }
   0x3   :  { %s289_s20 = scalar_lea.vmem %s24_s19, 512  ;;  %p294_p1 = scmp.lt.s32.totalorder %s24_s19, %s24_s19 }
   0x4   :  { %p290_p0 = scmp.ne.s32.totalorder %s24_s19, %s289_s20  ;;  %p295_p2 = scmp.lt.s32.totalorder %s289_s20, %s289_s20 }
   0x6   :  { %p296_p3 = por %p295_p2, %p294_p1 }
   0x8   :  { %p297_p4 = pnand %p296_p3, %p290_p0 }
   0xa   :  { %300 = shalt.err (!%p297_p4)
}
   0xb   :  { %s326_s21 = smov 128   ;;  %s327_s22 = smov 8  }
   0xc   :  { %29 = dma.hbm_to_vmem [thread:$0]  %s389_s3, 512, %s24_s19, [#allocation3], %s326_s21, %s326_s21, %s327_s22  }
   0xd   :  { %321 = dma.done.wait [#allocation3], 512  }
   0xe   :  { %322 = vsyncadd [#allocation3], 4294966784  ;;  %vm52_vm0 = vcmask 1041408   ;;  %vm45_vm1 = vcmask 15360   ;;  %v37_v0 = vld [vmem:[%s387_s1] sm:$0x3] }
   0xf   :  { %v35_v1 = vld [vmem:[%s386_s0] sm:$0xff]  ;;  %v36_v2 = vld [vmem:[%s386_s0 + $0x8] sm:$0xff]  ;;  %261 = vmatprep.subr.msk.mxu0 %vm52_vm0, %v37_v0  ;;  %v136_v3 = vld [vmem:[#allocation2 + $0x18] sm:$0xff]  ;;  %vm144_vm2 = vcmask 261120   ;;  %s328_s7 = smov [#allocation5]  }
  0x10   :  { %263 = vmatprep.mubr.msk.f32.mxu0 %vm45_vm1, %v35_v1  ;;  %262 = vmatpush3.msk.msra.mxu0 %vm52_vm0, %v37_v0  ;;  %v135_v4 = vld [vmem:[#allocation2 + $0x10] sm:$0xff]  ;;  %v134_v5 = vld [vmem:[#allocation2 + $0x8] sm:$0xff]  ;;  %v133_v6 = vld [vmem:[#allocation2] sm:$0xff]  ;;  %s233_s8 = sshll.u32 %s328_s7, 4  ;;  %s234_s8 = int_to_ptr.vmem [resolvable:$true] %s233_s8 }
  0x11   :  { %264 = vmatmul.mubr.msk.f32.vlgmr.msra.gmra.mxu0 %vm45_vm1, %v36_v2  ;;  %266 = vmatprep.subr.mxu1 %v136_v3  ;;  %v245_v7 = vld [vmem:[%s388_s2] ss:$0 sm:$0xff]  ;;  %s301_s2 = scalar_lea.vmem %s234_s8, 256  ;;  %p306_p6 = scmp.lt.s32.totalorder %s234_s8, %s234_s8 }
  0x12   :  { %267 = vmatpush3.msra.mxu1 %v136_v3  ;;  %v249_v14 = vld [vmem:[%s390_s4] ss:$0 sm:$0xff]  ;;  %p302_p5 = scmp.ne.s32.totalorder %s234_s8, %s301_s2  ;;  %p307_p7 = scmp.lt.s32.totalorder %s301_s2, %s301_s2 }
  0x13   :  { %268 = vmatprep.subr.mxu1 %v135_v4 }
  0x14   :  { %269 = vmatpush3.msra.mxu1 %v135_v4  ;;  %p308_p8 = por %p307_p7, %p306_p6 }
  0x15   :  { %270 = vmatprep.subr.mxu1 %v134_v5 }
  0x16   :  { %271 = vmatpush3.msra.mxu1 %v134_v5  ;;  %p309_p9 = pnand %p308_p8, %p302_p5 }
  0x17   :  { %272 = vmatprep.subr.mxu1 %v133_v6 }
  0x18   :  { %273 = vmatpush3.msra.mxu1 %v133_v6 }
  0xd1   :  { %v265_v8 = vpop.f32.mrf.mxu0 }
  0xd2   :  { %v128_v9 = vadd.f32 %v265_v8, %v245_v7 }
  0xd3   :  { %v122_v10 = vpop.f32.mrf.mxu0 }
  0xd4   :  { %v123_v11 = vadd.f32 %v245_v7, %v122_v10  ;;  %v132_v13 = vmax.f32 %v128_v9, 0.0 }
  0xd6   :  { %v131_v12 = vmax.f32 %v123_v11, 0.0 }
  0xd8   :  { %274 = vmatprep.mubr.msk.f32.mxu1 %vm144_vm2, %v131_v12 }
  0xd9   :  { %275 = vmatmul.mubr.msk.f32.vlgmr.msra.gmra.mxu1 %vm144_vm2, %v132_v13 }
 0x199   :  { %v276_v15 = vpop.f32.mrf.mxu1 }
 0x19a   :  { %v223_v16 = vadd.f32 %v276_v15, %v249_v14 }
 0x19b   :  { %v217_v17 = vpop.f32.mrf.mxu1 }
 0x19c   :  { %227 = vst.msk [vmem:[#allocation5 + $0x8] sm:$0xff] %vm144_vm2, %v223_v16  ;;  %v218_v18 = vadd.f32 %v249_v14, %v217_v17 }
 0x19e   :  { %226 = vst.msk [vmem:[#allocation5] sm:$0xff] %vm144_vm2, %v218_v18 }
 0x19f   :  { %312 = shalt.err (!%p309_p9)
}
 0x1a0   :  { %239 = dma.vmem_to_hbm [thread:$0]  %s234_s8, 256, %s391_s5, [#allocation4], %s326_s21, %s326_s21, %s327_s22  }
 0x1a1   :  { %323 = dma.done.wait [#allocation4], 256  }
 0x1a2   :  { %324 = vsyncadd [#allocation4], 4294967040 }
 0x1a3   :  { %243 = vsyncpa [#allocation3], 1 }
 0x1a4   :  { %244 = vsyncpa [#allocation4], 1 }

</bundles_post_ra>
